<compile_context>
chip_gen: v7x
topology: tpu7x:2x2x1
jax: 0.10.0
libtpu: 0.0.40
codegen_flags: <defaults>
</compile_context>

<pallas_src>
import jax
import jax.numpy as jnp
import numpy as np
from jax import lax
from jax.experimental import pallas as pl
from jax.experimental.pallas import tpu as pltpu

_Z_BOOST = 1e4  # sigmoid(_Z_BOOST + anything reasonable) == 1.0 exactly in f32


# ----------------------------------------------------------------------------
# Pallas kernel: one grid step == one (batch block, time chunk).
# The serial loop over the TT steps of the chunk runs inside the kernel.
# ----------------------------------------------------------------------------
def grud_chunk_kernel(stream_ref, w_ref, bhn_ref, h_ref):
    # stream_ref : (TT, BT, 4H)  [pre_r | pre_z(+ (1-te)*BIG) | pre_n | gamma_h]
    # w_ref      : (H, 4H)       [Wr_ih+Wr_hh | Wz_ih+Wz_hh | Wn_ih | Wn_hh]
    # bhn_ref    : (1, H)        hidden bias of the n-gate
    # h_ref      : (BT, H)       hidden-state carry / final output
    H = w_ref.shape[0]
    TT, BT = stream_ref.shape[0], stream_ref.shape[1]

    @pl.when(pl.program_id(1) == 0)
    def _():
        h_ref[...] = jnp.zeros_like(h_ref)

    w = w_ref[...]                                      # (H, 4H) — once per chunk
    bhn = jnp.broadcast_to(bhn_ref[...], (BT, H))       # broadcast hoisted

    def step(tt, h):
        row = stream_ref[tt]                            # (BT, 4H)
        g_h = row[:, 3 * H:]                            # (BT, H)  temporal decay
        h_dec = h * g_h
        d = jnp.dot(h_dec, w, preferred_element_type=jnp.float32)   # (BT, 4H)
        g = row[:, : 3 * H] + d[:, : 3 * H]             # (BT, 3H)
        r = jax.nn.sigmoid(g[:, :H])
        z = jax.nn.sigmoid(g[:, H:2 * H])               # == 1.0 when step absent
        n = jnp.tanh(g[:, 2 * H:] + r * (d[:, 3 * H:] + bhn))
        return (1.0 - z) * n + z * h_dec                # absent step -> h_dec

    unroll = TT if TT <= 16 else (8 if TT % 8 == 0 else 1)
    h_ref[...] = lax.fori_loop(0, TT, step, h_ref[...], unroll=unroll)


# ----------------------------------------------------------------------------
# Glue: LOCF imputation + cumulative delta-time (standard GRU-D recurrence).
# TODO(synk): exact semantics of the reference locf_impute_cum_dt were not
# provided; standard GRU-D/BRITS definitions are used here.
# ----------------------------------------------------------------------------
def locf_impute_cum_dt(values, masks, times):
    # values/masks: (B, T, F) ; times: (B, T)
    B, T, F = values.shape

    def step(carry, inp):
        last_x, prev_delta, prev_time, prev_mask = carry
        x_t, m_t, time_t = inp
        dt = (time_t - prev_time)[:, None]                  # (B, 1)
        delta_t = dt + (1.0 - prev_mask) * prev_delta       # (B, F)
        x_imp = m_t * x_t + (1.0 - m_t) * last_x
        return (x_imp, delta_t, time_t, m_t), (x_imp, delta_t)

    init = (
        jnp.zeros((B, F), jnp.float32),
        jnp.zeros((B, F), jnp.float32),
        times[:, 0],
        jnp.ones((B, F), jnp.float32),
    )
    xs = (
        jnp.transpose(values, (1, 0, 2)),
        jnp.transpose(masks, (1, 0, 2)),
        jnp.transpose(times, (1, 0)),
    )
    _, (x_imp_t, delta_t) = lax.scan(step, init, xs)
    return jnp.transpose(x_imp_t, (1, 0, 2)), jnp.transpose(delta_t, (1, 0, 2))


# ----------------------------------------------------------------------------
# Wrapper: hoisted precompute + pallas_call.
# ----------------------------------------------------------------------------
def grud_forward_pallas(times, values, masks, params, *, chunk=128):
    B, T, F = values.shape
    w_ih, w_hh = params["w_ih"], params["w_hh"]     # (3H, 2F+H), (3H, H)
    b_ih, b_hh = params["b_ih"], params["b_hh"]     # (3H,), (3H,)
    H = w_hh.shape[1]

    # ---- cheap glue / precompute (plain JAX, all h-independent) -------------
    emp_mean = jnp.sum(masks * values, axis=(0, 1)) / (
        jnp.sum(masks, axis=(0, 1)) + 1e-10)                          # (F,)
    x_imp, cdt = locf_impute_cum_dt(values, masks, times)             # (B,T,F)
    te = (times > 0.0).astype(jnp.float32)                            # (B,T)

    gamma_x = jnp.exp(-jnp.maximum(cdt * params["w_gx_diag"] + params["b_gx"], 0.0))
    gamma_h = jnp.exp(-jnp.maximum(
        jnp.einsum("btf,hf->bth", cdt, params["w_gh"]) + params["b_gh"], 0.0))
    x_h = gamma_x * x_imp + (1.0 - gamma_x) * emp_mean
    x_rep = masks * values + (1.0 - masks) * x_h

    # ---- split / restack the GRUCell weights --------------------------------
    w_ih_g = w_ih.reshape(3, H, 2 * F + H)
    Wx = jnp.transpose(w_ih_g[:, :, :F], (0, 2, 1))           # (3, F, H)
    Wh_i = jnp.transpose(w_ih_g[:, :, F:F + H], (0, 2, 1))    # (3, H, H)
    Wm = jnp.transpose(w_ih_g[:, :, F + H:], (0, 2, 1))       # (3, F, H)
    Whh = jnp.transpose(w_hh.reshape(3, H, H), (0, 2, 1))     # (3, H, H)
    bi = b_ih.reshape(3, H)
    bh = b_hh.reshape(3, H)

    # hoisted x/m projection: one big (B*T, 2F) @ (2F, 3H) matmul
    W_xm = jnp.concatenate([
        jnp.concatenate([Wx[0], Wx[1], Wx[2]], axis=1),       # (F, 3H)
        jnp.concatenate([Wm[0], Wm[1], Wm[2]], axis=1),       # (F, 3H)
    ], axis=0)                                                # (2F, 3H)
    # biases folded in: b_ih for all gates, b_hh only for r/z (n's b_hh stays
    # inside r*(...) and is added in the kernel).
    b_pre = jnp.concatenate([bi[0] + bh[0], bi[1] + bh[1], bi[2]], axis=0)[None]
    xm = jnp.concatenate([x_rep, masks], axis=-1)             # (B, T, 2F)
    pre = jnp.einsum("btk,kn->btn", xm, W_xm) + b_pre         # (B, T, 3H)

    # fold t_exist into the z-gate pre-activation: when te == 0 the boost
    # makes z == 1.0 exactly (f32), so h_new == h_dec — identical to
    # torch.where(t_exist, h_new, post-decay hidden_state).
    pre = pre.at[:, :, H:2 * H].add((1.0 - te)[:, :, None] * _Z_BOOST)

    # serial-path weight: gates stacked along N, r/z input+hidden pre-summed
    W_ser = jnp.concatenate(
        [Wh_i[0] + Whh[0], Wh_i[1] + Whh[1], Wh_i[2], Whh[2]], axis=1)  # (H, 4H)
    bh_n = bh[2][None]                                                   # (1, H)

    # ---- packed time-major stream (lane-dense: 4H = multiple of 128) --------
    stream = jnp.transpose(jnp.concatenate([pre, gamma_h], axis=-1), (1, 0, 2))

    # chunk + pad T (padded steps: pre_r=pre_n=0, pre_z=BIG, gamma_h=1
    # -> exact identity on h, no masking stream needed)
    TT = min(chunk, T)
    n_chunks = pl.cdiv(T, TT)
    T_pad = n_chunks * TT
    if T_pad != T:
        p = T_pad - T
        pad_stream = jnp.concatenate([
            jnp.zeros((p, B, H), jnp.float32),
            jnp.full((p, B, H), _Z_BOOST, jnp.float32),
            jnp.zeros((p, B, H), jnp.float32),
            jnp.ones((p, B, H), jnp.float32)], axis=-1)
        stream = jnp.concatenate([stream, pad_stream], axis=0)

    # batch blocking (shards independent recurrences across two cores at
    # larger B; degenerates to a single block for small B).
    BT = B
    if B >= 16 and (B // 2) % 8 == 0:
        BT = B // 2
    n_b = B // BT

    out = pl.pallas_call(
        grud_chunk_kernel,
        out_shape=jax.ShapeDtypeStruct((B, H), jnp.float32),
        grid_spec=pltpu.PrefetchScalarGridSpec(
            num_scalar_prefetch=0,
            grid=(n_b, n_chunks),
            in_specs=[
                pl.BlockSpec((TT, BT, 4 * H), lambda b, c: (c, b, 0)),  # stream
                pl.BlockSpec((H, 4 * H), lambda b, c: (0, 0)),          # W_ser
                pl.BlockSpec((1, H), lambda b, c: (0, 0)),              # bh_n
            ],
            out_specs=pl.BlockSpec((BT, H), lambda b, c: (b, 0)),
        ),
        compiler_params=pltpu.CompilerParams(
            dimension_semantics=("parallel", "arbitrary")),
    )(stream, W_ser, bh_n)
    return out


# ----------------------------------------------------------------------------
# Pure-JAX reference mirroring the PyTorch forward (uses the raw, unstacked
# parameters, so the weight restacking above is also verified).
# ----------------------------------------------------------------------------
def grud_forward_ref(times, values, masks, params):
    B, T, F = values.shape
    w_ih, w_hh = params["w_ih"], params["w_hh"]
    b_ih, b_hh = params["b_ih"], params["b_hh"]
    H = w_hh.shape[1]

    emp_mean = jnp.sum(masks * values, axis=(0, 1)) / (
        jnp.sum(masks, axis=(0, 1)) + 1e-10)
    x_imp, cdt = locf_impute_cum_dt(values, masks, times)
    t_exist = times > 0.0

    h = jnp.zeros((B, H), jnp.float32)
    for t in range(T):
        x = values[:, t, :]
        m = masks[:, t, :]
        d = cdt[:, t, :]
        x_im = x_imp[:, t, :]
        te = t_exist[:, t][:, None]

        gamma_x = jnp.exp(-jnp.maximum(d * params["w_gx_diag"] + params["b_gx"], 0.0))
        gamma_h = jnp.exp(-jnp.maximum(d @ params["w_gh"].T + params["b_gh"], 0.0))
        h = h * gamma_h
        x_h = gamma_x * x_im + (1.0 - gamma_x) * emp_mean[None, :]
        x_rep = m * x + (1.0 - m) * x_h

        inputs = jnp.concatenate([x_rep, h, m], axis=1)       # (B, 2F+H)
        gi = inputs @ w_ih.T + b_ih
        gh = h @ w_hh.T + b_hh
        i_r, i_z, i_n = jnp.split(gi, 3, axis=1)
        h_r, h_z, h_n = jnp.split(gh, 3, axis=1)
        r = jax.nn.sigmoid(i_r + h_r)
        z = jax.nn.sigmoid(i_z + h_z)
        n = jnp.tanh(i_n + r * h_n)
        h_new = (1.0 - z) * n + z * h
        h = jnp.where(te, h_new, h)
    return h


# ----------------------------------------------------------------------------
# Deterministic parameter init (shapes follow the nn.Module __init__).
# ----------------------------------------------------------------------------
def init_params(key, n_features, hidden_dim):
    F, H = n_features, hidden_dim
    d_in = 2 * F + H
    ks = jax.random.split(key, 8)
    u = lambda k, shape, bound: jax.random.uniform(k, shape, jnp.float32, -bound, bound)

    k_gru = 1.0 / np.sqrt(H)
    w_ih = u(ks[0], (3 * H, d_in), k_gru)     # GRUCell weight_ih (gates r,z,n)
    w_hh = u(ks[1], (3 * H, H), k_gru)
    b_ih = u(ks[2], (3 * H,), k_gru)
    b_hh = u(ks[3], (3 * H,), k_gru)

    # TemporalDecay(F -> H, diag=False)
    W_gh = u(ks[4], (H, F), 1.0 / np.sqrt(H))
    b_gh = u(ks[5], (H,), 1.0 / np.sqrt(H))
    # TemporalDecay(F -> F, diag=True): only the diagonal is used
    W_gx_full = u(ks[6], (F, F), 1.0 / np.sqrt(F))
    b_gx = u(ks[7], (F,), 1.0 / np.sqrt(F))

    return {
        "w_ih": w_ih, "w_hh": w_hh, "b_ih": b_ih, "b_hh": b_hh,
        "w_gh": W_gh, "b_gh": b_gh,
        "w_gx_diag": jnp.diagonal(W_gx_full), "b_gx": b_gx,
    }
    # NOTE: rec_lyr (Linear->Tanh->Linear) is only used by generate_seq, not
    # by forward(), so it is not instantiated here.
    # TODO(synk): generate_seq / rec_lyr path not implemented (unused by forward).


if __name__ == "__main__":
    B, T, F, H = 8, 20, 8, 32   # T=20 with chunk=8 exercises chunking + padding

    key = jax.random.PRNGKey(0)
    k_par, k_vals, k_mask, k_times, k_len = jax.random.split(key, 5)

    params = init_params(k_par, F, H)

    values = jax.random.normal(k_vals, (B, T, F), jnp.float32)
    masks = (jax.random.uniform(k_mask, (B, T, F)) < 0.7).astype(jnp.float32)
    times_raw = jnp.cumsum(
        jax.random.uniform(k_times, (B, T), jnp.float32, 0.1, 1.0), axis=1)
    lengths = jax.random.randint(k_len, (B,), T // 2, T + 1)
    valid = (jnp.arange(T)[None, :] < lengths[:, None]).astype(jnp.float32)
    times = times_raw * valid

    out = grud_forward_pallas(times, values, masks, params, chunk=8)
    out = jax.block_until_ready(out)

    ref = grud_forward_ref(times, values, masks, params)
    np.testing.assert_allclose(np.asarray(out), np.asarray(ref), rtol=1e-4, atol=1e-4)

    print("KERNEL_OK")
</pallas_src>

<mosaic_0001>
module attributes {stable_mosaic.version = 11 : i64} {
  func.func @grud_chunk_kernel(%arg0: i32, %arg1: i32, %arg2: memref<8x8x128xf32, #tpu.memory_space<vmem>>, %arg3: memref<32x128xf32, #tpu.memory_space<vmem>>, %arg4: memref<1x32xf32, #tpu.memory_space<vmem>>, %arg5: memref<8x32xf32, #tpu.memory_space<vmem>>) attributes {dimension_semantics = [#tpu.dimension_semantics<parallel>, #tpu.dimension_semantics<arbitrary>], iteration_bounds = array<i64: 1, 3>, scalar_prefetch = 0 : i64, scratch_operands = 0 : i64, tpu.core_type = #tpu.core_type<tc>, window_params = [{transform_indices = @transform_0, window_bounds = array<i64: 8, 8, 128>}, {pipeline_mode = #tpu.pipeline_mode<synchronous>, transform_indices = @transform_1, window_bounds = array<i64: 32, 128>}, {pipeline_mode = #tpu.pipeline_mode<synchronous>, transform_indices = @transform_2, window_bounds = array<i64: 1, 32>}, {transform_indices = @transform_3, window_bounds = array<i64: 8, 32>}]} {
    %c0_i32 = arith.constant 0 : i32
    %0 = arith.cmpi eq, %arg1, %c0_i32 : i32
    %1 = arith.extui %0 : i1 to i32
    %c0_i32_0 = arith.constant 0 : i32
    %2 = arith.cmpi ne, %1, %c0_i32_0 : i32
    scf.if %2 {
      %cst_56 = arith.constant 0.000000e+00 : f32
      %265 = vector.broadcast %cst_56 : f32 to vector<8x32xf32>
      %c0_57 = arith.constant 0 : index
      %c0_58 = arith.constant 0 : index
      %266 = vector.load %arg5[%c0_57, %c0_58] : memref<8x32xf32, #tpu.memory_space<vmem>>, vector<8x32xf32>
      tpu.vector_store %arg5[%c0_57, %c0_58], %265 {strides = array<i32>} : memref<8x32xf32, #tpu.memory_space<vmem>>, vector<8x32xf32>,
    } else {
    }
    %c0 = arith.constant 0 : index
    %c0_1 = arith.constant 0 : index
    %3 = vector.load %arg3[%c0, %c0_1] : memref<32x128xf32, #tpu.memory_space<vmem>>, vector<32x128xf32>
    %c0_2 = arith.constant 0 : index
    %c0_3 = arith.constant 0 : index
    %4 = vector.load %arg4[%c0_2, %c0_3] : memref<1x32xf32, #tpu.memory_space<vmem>>, vector<1x32xf32>
    %5 = vector.shape_cast %4 : vector<1x32xf32> to vector<1x32xf32>
    %6 = vector.broadcast %5 : vector<1x32xf32> to vector<8x32xf32>
    %c0_4 = arith.constant 0 : index
    %c0_5 = arith.constant 0 : index
    %7 = vector.load %arg5[%c0_4, %c0_5] : memref<8x32xf32, #tpu.memory_space<vmem>>, vector<8x32xf32>
    %c0_i32_6 = arith.constant 0 : i32
    %8 = arith.index_cast %c0_i32_6 : i32 to index
    %c0_7 = arith.constant 0 : index
    %c0_8 = arith.constant 0 : index
    %9 = vector.load %arg2[%8, %c0_7, %c0_8] : memref<8x8x128xf32, #tpu.memory_space<vmem>>, vector<1x8x128xf32>
    %10 = vector.shape_cast %9 : vector<1x8x128xf32> to vector<8x128xf32>
    %11 = vector.extract_strided_slice %10 {offsets = [0, 96], sizes = [8, 32], strides = [1, 1]} : vector<8x128xf32> to vector<8x32xf32>
    %12 = arith.mulf %7, %11 : vector<8x32xf32>
    %cst = arith.constant dense<0.000000e+00> : vector<8x128xf32>
    %13 = tpu.matmul %12, %3, %cst {dimension_numbers = #tpu.dot_dimension_numbers<[1], [0], [0], [1], [0, 0, 1, 1], [], []>} : vector<8x32xf32>, vector<32x128xf32>, vector<8x128xf32> -> vector<8x128xf32>
    %14 = vector.extract_strided_slice %10 {offsets = [0, 0], sizes = [8, 96], strides = [1, 1]} : vector<8x128xf32> to vector<8x96xf32>
    %15 = vector.extract_strided_slice %13 {offsets = [0, 0], sizes = [8, 96], strides = [1, 1]} : vector<8x128xf32> to vector<8x96xf32>
    %16 = arith.addf %14, %15 : vector<8x96xf32>
    %17 = vector.extract_strided_slice %16 {offsets = [0, 0], sizes = [8, 32], strides = [1, 1]} : vector<8x96xf32> to vector<8x32xf32>
    %18 = arith.negf %17 : vector<8x32xf32>
    %19 = math.exp %18 : vector<8x32xf32>
    %cst_9 = arith.constant 1.000000e+00 : f32
    %20 = vector.broadcast %cst_9 : f32 to vector<8x32xf32>
    %21 = arith.addf %20, %19 : vector<8x32xf32>
    %22 = arith.divf %20, %21 : vector<8x32xf32>
    %23 = vector.extract_strided_slice %16 {offsets = [0, 32], sizes = [8, 32], strides = [1, 1]} : vector<8x96xf32> to vector<8x32xf32>
    %24 = arith.negf %23 : vector<8x32xf32>
    %25 = math.exp %24 : vector<8x32xf32>
    %cst_10 = arith.constant 1.000000e+00 : f32
    %26 = vector.broadcast %cst_10 : f32 to vector<8x32xf32>
    %27 = arith.addf %26, %25 : vector<8x32xf32>
    %28 = arith.divf %26, %27 : vector<8x32xf32>
    %29 = vector.extract_strided_slice %16 {offsets = [0, 64], sizes = [8, 32], strides = [1, 1]} : vector<8x96xf32> to vector<8x32xf32>
    %30 = vector.extract_strided_slice %13 {offsets = [0, 96], sizes = [8, 32], strides = [1, 1]} : vector<8x128xf32> to vector<8x32xf32>
    %31 = arith.addf %30, %6 : vector<8x32xf32>
    %32 = arith.mulf %22, %31 : vector<8x32xf32>
    %33 = arith.addf %29, %32 : vector<8x32xf32>
    %34 = math.tanh %33 : vector<8x32xf32>
    %cst_11 = arith.constant 1.000000e+00 : f32
    %35 = vector.broadcast %cst_11 : f32 to vector<8x32xf32>
    %36 = arith.subf %35, %28 : vector<8x32xf32>
    %37 = arith.mulf %36, %34 : vector<8x32xf32>
    %38 = arith.mulf %28, %12 : vector<8x32xf32>
    %39 = arith.addf %37, %38 : vector<8x32xf32>
    %c1_i32 = arith.constant 1 : i32
    %40 = arith.index_cast %c1_i32 : i32 to index
    %c0_12 = arith.constant 0 : index
    %c0_13 = arith.constant 0 : index
    %41 = vector.load %arg2[%40, %c0_12, %c0_13] : memref<8x8x128xf32, #tpu.memory_space<vmem>>, vector<1x8x128xf32>
    %42 = vector.shape_cast %41 : vector<1x8x128xf32> to vector<8x128xf32>
    %43 = vector.extract_strided_slice %42 {offsets = [0, 96], sizes = [8, 32], strides = [1, 1]} : vector<8x128xf32> to vector<8x32xf32>
    %44 = arith.mulf %39, %43 : vector<8x32xf32>
    %cst_14 = arith.constant dense<0.000000e+00> : vector<8x128xf32>
    %45 = tpu.matmul %44, %3, %cst_14 {dimension_numbers = #tpu.dot_dimension_numbers<[1], [0], [0], [1], [0, 0, 1, 1], [], []>} : vector<8x32xf32>, vector<32x128xf32>, vector<8x128xf32> -> vector<8x128xf32>
    %46 = vector.extract_strided_slice %42 {offsets = [0, 0], sizes = [8, 96], strides = [1, 1]} : vector<8x128xf32> to vector<8x96xf32>
    %47 = vector.extract_strided_slice %45 {offsets = [0, 0], sizes = [8, 96], strides = [1, 1]} : vector<8x128xf32> to vector<8x96xf32>
    %48 = arith.addf %46, %47 : vector<8x96xf32>
    %49 = vector.extract_strided_slice %48 {offsets = [0, 0], sizes = [8, 32], strides = [1, 1]} : vector<8x96xf32> to vector<8x32xf32>
    %50 = arith.negf %49 : vector<8x32xf32>
    %51 = math.exp %50 : vector<8x32xf32>
    %cst_15 = arith.constant 1.000000e+00 : f32
    %52 = vector.broadcast %cst_15 : f32 to vector<8x32xf32>
    %53 = arith.addf %52, %51 : vector<8x32xf32>
    %54 = arith.divf %52, %53 : vector<8x32xf32>
    %55 = vector.extract_strided_slice %48 {offsets = [0, 32], sizes = [8, 32], strides = [1, 1]} : vector<8x96xf32> to vector<8x32xf32>
    %56 = arith.negf %55 : vector<8x32xf32>
    %57 = math.exp %56 : vector<8x32xf32>
    %cst_16 = arith.constant 1.000000e+00 : f32
    %58 = vector.broadcast %cst_16 : f32 to vector<8x32xf32>
    %59 = arith.addf %58, %57 : vector<8x32xf32>
    %60 = arith.divf %58, %59 : vector<8x32xf32>
    %61 = vector.extract_strided_slice %48 {offsets = [0, 64], sizes = [8, 32], strides = [1, 1]} : vector<8x96xf32> to vector<8x32xf32>
    %62 = vector.extract_strided_slice %45 {offsets = [0, 96], sizes = [8, 32], strides = [1, 1]} : vector<8x128xf32> to vector<8x32xf32>
    %63 = arith.addf %62, %6 : vector<8x32xf32>
    %64 = arith.mulf %54, %63 : vector<8x32xf32>
    %65 = arith.addf %61, %64 : vector<8x32xf32>
    %66 = math.tanh %65 : vector<8x32xf32>
    %cst_17 = arith.constant 1.000000e+00 : f32
    %67 = vector.broadcast %cst_17 : f32 to vector<8x32xf32>
    %68 = arith.subf %67, %60 : vector<8x32xf32>
    %69 = arith.mulf %68, %66 : vector<8x32xf32>
    %70 = arith.mulf %60, %44 : vector<8x32xf32>
    %71 = arith.addf %69, %70 : vector<8x32xf32>
    %c2_i32 = arith.constant 2 : i32
    %72 = arith.index_cast %c2_i32 : i32 to index
    %c0_18 = arith.constant 0 : index
    %c0_19 = arith.constant 0 : index
    %73 = vector.load %arg2[%72, %c0_18, %c0_19] : memref<8x8x128xf32, #tpu.memory_space<vmem>>, vector<1x8x128xf32>
    %74 = vector.shape_cast %73 : vector<1x8x128xf32> to vector<8x128xf32>
    %75 = vector.extract_strided_slice %74 {offsets = [0, 96], sizes = [8, 32], strides = [1, 1]} : vector<8x128xf32> to vector<8x32xf32>
    %76 = arith.mulf %71, %75 : vector<8x32xf32>
    %cst_20 = arith.constant dense<0.000000e+00> : vector<8x128xf32>
    %77 = tpu.matmul %76, %3, %cst_20 {dimension_numbers = #tpu.dot_dimension_numbers<[1], [0], [0], [1], [0, 0, 1, 1], [], []>} : vector<8x32xf32>, vector<32x128xf32>, vector<8x128xf32> -> vector<8x128xf32>
    %78 = vector.extract_strided_slice %74 {offsets = [0, 0], sizes = [8, 96], strides = [1, 1]} : vector<8x128xf32> to vector<8x96xf32>
    %79 = vector.extract_strided_slice %77 {offsets = [0, 0], sizes = [8, 96], strides = [1, 1]} : vector<8x128xf32> to vector<8x96xf32>
    %80 = arith.addf %78, %79 : vector<8x96xf32>
    %81 = vector.extract_strided_slice %80 {offsets = [0, 0], sizes = [8, 32], strides = [1, 1]} : vector<8x96xf32> to vector<8x32xf32>
    %82 = arith.negf %81 : vector<8x32xf32>
    %83 = math.exp %82 : vector<8x32xf32>
    %cst_21 = arith.constant 1.000000e+00 : f32
    %84 = vector.broadcast %cst_21 : f32 to vector<8x32xf32>
    %85 = arith.addf %84, %83 : vector<8x32xf32>
    %86 = arith.divf %84, %85 : vector<8x32xf32>
    %87 = vector.extract_strided_slice %80 {offsets = [0, 32], sizes = [8, 32], strides = [1, 1]} : vector<8x96xf32> to vector<8x32xf32>
    %88 = arith.negf %87 : vector<8x32xf32>
    %89 = math.exp %88 : vector<8x32xf32>
    %cst_22 = arith.constant 1.000000e+00 : f32
    %90 = vector.broadcast %cst_22 : f32 to vector<8x32xf32>
    %91 = arith.addf %90, %89 : vector<8x32xf32>
    %92 = arith.divf %90, %91 : vector<8x32xf32>
    %93 = vector.extract_strided_slice %80 {offsets = [0, 64], sizes = [8, 32], strides = [1, 1]} : vector<8x96xf32> to vector<8x32xf32>
    %94 = vector.extract_strided_slice %77 {offsets = [0, 96], sizes = [8, 32], strides = [1, 1]} : vector<8x128xf32> to vector<8x32xf32>
    %95 = arith.addf %94, %6 : vector<8x32xf32>
    %96 = arith.mulf %86, %95 : vector<8x32xf32>
    %97 = arith.addf %93, %96 : vector<8x32xf32>
    %98 = math.tanh %97 : vector<8x32xf32>
    %cst_23 = arith.constant 1.000000e+00 : f32
    %99 = vector.broadcast %cst_23 : f32 to vector<8x32xf32>
    %100 = arith.subf %99, %92 : vector<8x32xf32>
    %101 = arith.mulf %100, %98 : vector<8x32xf32>
    %102 = arith.mulf %92, %76 : vector<8x32xf32>
    %103 = arith.addf %101, %102 : vector<8x32xf32>
    %c3_i32 = arith.constant 3 : i32
    %104 = arith.index_cast %c3_i32 : i32 to index
    %c0_24 = arith.constant 0 : index
    %c0_25 = arith.constant 0 : index
    %105 = vector.load %arg2[%104, %c0_24, %c0_25] : memref<8x8x128xf32, #tpu.memory_space<vmem>>, vector<1x8x128xf32>
    %106 = vector.shape_cast %105 : vector<1x8x128xf32> to vector<8x128xf32>
    %107 = vector.extract_strided_slice %106 {offsets = [0, 96], sizes = [8, 32], strides = [1, 1]} : vector<8x128xf32> to vector<8x32xf32>
    %108 = arith.mulf %103, %107 : vector<8x32xf32>
    %cst_26 = arith.constant dense<0.000000e+00> : vector<8x128xf32>
    %109 = tpu.matmul %108, %3, %cst_26 {dimension_numbers = #tpu.dot_dimension_numbers<[1], [0], [0], [1], [0, 0, 1, 1], [], []>} : vector<8x32xf32>, vector<32x128xf32>, vector<8x128xf32> -> vector<8x128xf32>
    %110 = vector.extract_strided_slice %106 {offsets = [0, 0], sizes = [8, 96], strides = [1, 1]} : vector<8x128xf32> to vector<8x96xf32>
    %111 = vector.extract_strided_slice %109 {offsets = [0, 0], sizes = [8, 96], strides = [1, 1]} : vector<8x128xf32> to vector<8x96xf32>
    %112 = arith.addf %110, %111 : vector<8x96xf32>
    %113 = vector.extract_strided_slice %112 {offsets = [0, 0], sizes = [8, 32], strides = [1, 1]} : vector<8x96xf32> to vector<8x32xf32>
    %114 = arith.negf %113 : vector<8x32xf32>
    %115 = math.exp %114 : vector<8x32xf32>
    %cst_27 = arith.constant 1.000000e+00 : f32
    %116 = vector.broadcast %cst_27 : f32 to vector<8x32xf32>
    %117 = arith.addf %116, %115 : vector<8x32xf32>
    %118 = arith.divf %116, %117 : vector<8x32xf32>
    %119 = vector.extract_strided_slice %112 {offsets = [0, 32], sizes = [8, 32], strides = [1, 1]} : vector<8x96xf32> to vector<8x32xf32>
    %120 = arith.negf %119 : vector<8x32xf32>
    %121 = math.exp %120 : vector<8x32xf32>
    %cst_28 = arith.constant 1.000000e+00 : f32
    %122 = vector.broadcast %cst_28 : f32 to vector<8x32xf32>
    %123 = arith.addf %122, %121 : vector<8x32xf32>
    %124 = arith.divf %122, %123 : vector<8x32xf32>
    %125 = vector.extract_strided_slice %112 {offsets = [0, 64], sizes = [8, 32], strides = [1, 1]} : vector<8x96xf32> to vector<8x32xf32>
    %126 = vector.extract_strided_slice %109 {offsets = [0, 96], sizes = [8, 32], strides = [1, 1]} : vector<8x128xf32> to vector<8x32xf32>
    %127 = arith.addf %126, %6 : vector<8x32xf32>
    %128 = arith.mulf %118, %127 : vector<8x32xf32>
    %129 = arith.addf %125, %128 : vector<8x32xf32>
    %130 = math.tanh %129 : vector<8x32xf32>
    %cst_29 = arith.constant 1.000000e+00 : f32
    %131 = vector.broadcast %cst_29 : f32 to vector<8x32xf32>
    %132 = arith.subf %131, %124 : vector<8x32xf32>
    %133 = arith.mulf %132, %130 : vector<8x32xf32>
    %134 = arith.mulf %124, %108 : vector<8x32xf32>
    %135 = arith.addf %133, %134 : vector<8x32xf32>
    %c4_i32 = arith.constant 4 : i32
    %136 = arith.index_cast %c4_i32 : i32 to index
    %c0_30 = arith.constant 0 : index
    %c0_31 = arith.constant 0 : index
    %137 = vector.load %arg2[%136, %c0_30, %c0_31] : memref<8x8x128xf32, #tpu.memory_space<vmem>>, vector<1x8x128xf32>
    %138 = vector.shape_cast %137 : vector<1x8x128xf32> to vector<8x128xf32>
    %139 = vector.extract_strided_slice %138 {offsets = [0, 96], sizes = [8, 32], strides = [1, 1]} : vector<8x128xf32> to vector<8x32xf32>
    %140 = arith.mulf %135, %139 : vector<8x32xf32>
    %cst_32 = arith.constant dense<0.000000e+00> : vector<8x128xf32>
    %141 = tpu.matmul %140, %3, %cst_32 {dimension_numbers = #tpu.dot_dimension_numbers<[1], [0], [0], [1], [0, 0, 1, 1], [], []>} : vector<8x32xf32>, vector<32x128xf32>, vector<8x128xf32> -> vector<8x128xf32>
    %142 = vector.extract_strided_slice %138 {offsets = [0, 0], sizes = [8, 96], strides = [1, 1]} : vector<8x128xf32> to vector<8x96xf32>
    %143 = vector.extract_strided_slice %141 {offsets = [0, 0], sizes = [8, 96], strides = [1, 1]} : vector<8x128xf32> to vector<8x96xf32>
    %144 = arith.addf %142, %143 : vector<8x96xf32>
    %145 = vector.extract_strided_slice %144 {offsets = [0, 0], sizes = [8, 32], strides = [1, 1]} : vector<8x96xf32> to vector<8x32xf32>
    %146 = arith.negf %145 : vector<8x32xf32>
    %147 = math.exp %146 : vector<8x32xf32>
    %cst_33 = arith.constant 1.000000e+00 : f32
    %148 = vector.broadcast %cst_33 : f32 to vector<8x32xf32>
    %149 = arith.addf %148, %147 : vector<8x32xf32>
    %150 = arith.divf %148, %149 : vector<8x32xf32>
    %151 = vector.extract_strided_slice %144 {offsets = [0, 32], sizes = [8, 32], strides = [1, 1]} : vector<8x96xf32> to vector<8x32xf32>
    %152 = arith.negf %151 : vector<8x32xf32>
    %153 = math.exp %152 : vector<8x32xf32>
    %cst_34 = arith.constant 1.000000e+00 : f32
    %154 = vector.broadcast %cst_34 : f32 to vector<8x32xf32>
    %155 = arith.addf %154, %153 : vector<8x32xf32>
    %156 = arith.divf %154, %155 : vector<8x32xf32>
    %157 = vector.extract_strided_slice %144 {offsets = [0, 64], sizes = [8, 32], strides = [1, 1]} : vector<8x96xf32> to vector<8x32xf32>
    %158 = vector.extract_strided_slice %141 {offsets = [0, 96], sizes = [8, 32], strides = [1, 1]} : vector<8x128xf32> to vector<8x32xf32>
    %159 = arith.addf %158, %6 : vector<8x32xf32>
    %160 = arith.mulf %150, %159 : vector<8x32xf32>
    %161 = arith.addf %157, %160 : vector<8x32xf32>
    %162 = math.tanh %161 : vector<8x32xf32>
    %cst_35 = arith.constant 1.000000e+00 : f32
    %163 = vector.broadcast %cst_35 : f32 to vector<8x32xf32>
    %164 = arith.subf %163, %156 : vector<8x32xf32>
    %165 = arith.mulf %164, %162 : vector<8x32xf32>
    %166 = arith.mulf %156, %140 : vector<8x32xf32>
    %167 = arith.addf %165, %166 : vector<8x32xf32>
    %c5_i32 = arith.constant 5 : i32
    %168 = arith.index_cast %c5_i32 : i32 to index
    %c0_36 = arith.constant 0 : index
    %c0_37 = arith.constant 0 : index
    %169 = vector.load %arg2[%168, %c0_36, %c0_37] : memref<8x8x128xf32, #tpu.memory_space<vmem>>, vector<1x8x128xf32>
    %170 = vector.shape_cast %169 : vector<1x8x128xf32> to vector<8x128xf32>
    %171 = vector.extract_strided_slice %170 {offsets = [0, 96], sizes = [8, 32], strides = [1, 1]} : vector<8x128xf32> to vector<8x32xf32>
    %172 = arith.mulf %167, %171 : vector<8x32xf32>
    %cst_38 = arith.constant dense<0.000000e+00> : vector<8x128xf32>
    %173 = tpu.matmul %172, %3, %cst_38 {dimension_numbers = #tpu.dot_dimension_numbers<[1], [0], [0], [1], [0, 0, 1, 1], [], []>} : vector<8x32xf32>, vector<32x128xf32>, vector<8x128xf32> -> vector<8x128xf32>
    %174 = vector.extract_strided_slice %170 {offsets = [0, 0], sizes = [8, 96], strides = [1, 1]} : vector<8x128xf32> to vector<8x96xf32>
    %175 = vector.extract_strided_slice %173 {offsets = [0, 0], sizes = [8, 96], strides = [1, 1]} : vector<8x128xf32> to vector<8x96xf32>
    %176 = arith.addf %174, %175 : vector<8x96xf32>
    %177 = vector.extract_strided_slice %176 {offsets = [0, 0], sizes = [8, 32], strides = [1, 1]} : vector<8x96xf32> to vector<8x32xf32>
    %178 = arith.negf %177 : vector<8x32xf32>
    %179 = math.exp %178 : vector<8x32xf32>
    %cst_39 = arith.constant 1.000000e+00 : f32
    %180 = vector.broadcast %cst_39 : f32 to vector<8x32xf32>
    %181 = arith.addf %180, %179 : vector<8x32xf32>
    %182 = arith.divf %180, %181 : vector<8x32xf32>
    %183 = vector.extract_strided_slice %176 {offsets = [0, 32], sizes = [8, 32], strides = [1, 1]} : vector<8x96xf32> to vector<8x32xf32>
    %184 = arith.negf %183 : vector<8x32xf32>
    %185 = math.exp %184 : vector<8x32xf32>
    %cst_40 = arith.constant 1.000000e+00 : f32
    %186 = vector.broadcast %cst_40 : f32 to vector<8x32xf32>
    %187 = arith.addf %186, %185 : vector<8x32xf32>
    %188 = arith.divf %186, %187 : vector<8x32xf32>
    %189 = vector.extract_strided_slice %176 {offsets = [0, 64], sizes = [8, 32], strides = [1, 1]} : vector<8x96xf32> to vector<8x32xf32>
    %190 = vector.extract_strided_slice %173 {offsets = [0, 96], sizes = [8, 32], strides = [1, 1]} : vector<8x128xf32> to vector<8x32xf32>
    %191 = arith.addf %190, %6 : vector<8x32xf32>
    %192 = arith.mulf %182, %191 : vector<8x32xf32>
    %193 = arith.addf %189, %192 : vector<8x32xf32>
    %194 = math.tanh %193 : vector<8x32xf32>
    %cst_41 = arith.constant 1.000000e+00 : f32
    %195 = vector.broadcast %cst_41 : f32 to vector<8x32xf32>
    %196 = arith.subf %195, %188 : vector<8x32xf32>
    %197 = arith.mulf %196, %194 : vector<8x32xf32>
    %198 = arith.mulf %188, %172 : vector<8x32xf32>
    %199 = arith.addf %197, %198 : vector<8x32xf32>
    %c6_i32 = arith.constant 6 : i32
    %200 = arith.index_cast %c6_i32 : i32 to index
    %c0_42 = arith.constant 0 : index
    %c0_43 = arith.constant 0 : index
    %201 = vector.load %arg2[%200, %c0_42, %c0_43] : memref<8x8x128xf32, #tpu.memory_space<vmem>>, vector<1x8x128xf32>
    %202 = vector.shape_cast %201 : vector<1x8x128xf32> to vector<8x128xf32>
    %203 = vector.extract_strided_slice %202 {offsets = [0, 96], sizes = [8, 32], strides = [1, 1]} : vector<8x128xf32> to vector<8x32xf32>
    %204 = arith.mulf %199, %203 : vector<8x32xf32>
    %cst_44 = arith.constant dense<0.000000e+00> : vector<8x128xf32>
    %205 = tpu.matmul %204, %3, %cst_44 {dimension_numbers = #tpu.dot_dimension_numbers<[1], [0], [0], [1], [0, 0, 1, 1], [], []>} : vector<8x32xf32>, vector<32x128xf32>, vector<8x128xf32> -> vector<8x128xf32>
    %206 = vector.extract_strided_slice %202 {offsets = [0, 0], sizes = [8, 96], strides = [1, 1]} : vector<8x128xf32> to vector<8x96xf32>
    %207 = vector.extract_strided_slice %205 {offsets = [0, 0], sizes = [8, 96], strides = [1, 1]} : vector<8x128xf32> to vector<8x96xf32>
    %208 = arith.addf %206, %207 : vector<8x96xf32>
    %209 = vector.extract_strided_slice %208 {offsets = [0, 0], sizes = [8, 32], strides = [1, 1]} : vector<8x96xf32> to vector<8x32xf32>
    %210 = arith.negf %209 : vector<8x32xf32>
    %211 = math.exp %210 : vector<8x32xf32>
    %cst_45 = arith.constant 1.000000e+00 : f32
    %212 = vector.broadcast %cst_45 : f32 to vector<8x32xf32>
    %213 = arith.addf %212, %211 : vector<8x32xf32>
    %214 = arith.divf %212, %213 : vector<8x32xf32>
    %215 = vector.extract_strided_slice %208 {offsets = [0, 32], sizes = [8, 32], strides = [1, 1]} : vector<8x96xf32> to vector<8x32xf32>
    %216 = arith.negf %215 : vector<8x32xf32>
    %217 = math.exp %216 : vector<8x32xf32>
    %cst_46 = arith.constant 1.000000e+00 : f32
    %218 = vector.broadcast %cst_46 : f32 to vector<8x32xf32>
    %219 = arith.addf %218, %217 : vector<8x32xf32>
    %220 = arith.divf %218, %219 : vector<8x32xf32>
    %221 = vector.extract_strided_slice %208 {offsets = [0, 64], sizes = [8, 32], strides = [1, 1]} : vector<8x96xf32> to vector<8x32xf32>
    %222 = vector.extract_strided_slice %205 {offsets = [0, 96], sizes = [8, 32], strides = [1, 1]} : vector<8x128xf32> to vector<8x32xf32>
    %223 = arith.addf %222, %6 : vector<8x32xf32>
    %224 = arith.mulf %214, %223 : vector<8x32xf32>
    %225 = arith.addf %221, %224 : vector<8x32xf32>
    %226 = math.tanh %225 : vector<8x32xf32>
    %cst_47 = arith.constant 1.000000e+00 : f32
    %227 = vector.broadcast %cst_47 : f32 to vector<8x32xf32>
    %228 = arith.subf %227, %220 : vector<8x32xf32>
    %229 = arith.mulf %228, %226 : vector<8x32xf32>
    %230 = arith.mulf %220, %204 : vector<8x32xf32>
    %231 = arith.addf %229, %230 : vector<8x32xf32>
    %c7_i32 = arith.constant 7 : i32
    %232 = arith.index_cast %c7_i32 : i32 to index
    %c0_48 = arith.constant 0 : index
    %c0_49 = arith.constant 0 : index
    %233 = vector.load %arg2[%232, %c0_48, %c0_49] : memref<8x8x128xf32, #tpu.memory_space<vmem>>, vector<1x8x128xf32>
    %234 = vector.shape_cast %233 : vector<1x8x128xf32> to vector<8x128xf32>
    %235 = vector.extract_strided_slice %234 {offsets = [0, 96], sizes = [8, 32], strides = [1, 1]} : vector<8x128xf32> to vector<8x32xf32>
    %236 = arith.mulf %231, %235 : vector<8x32xf32>
    %cst_50 = arith.constant dense<0.000000e+00> : vector<8x128xf32>
    %237 = tpu.matmul %236, %3, %cst_50 {dimension_numbers = #tpu.dot_dimension_numbers<[1], [0], [0], [1], [0, 0, 1, 1], [], []>} : vector<8x32xf32>, vector<32x128xf32>, vector<8x128xf32> -> vector<8x128xf32>
    %238 = vector.extract_strided_slice %234 {offsets = [0, 0], sizes = [8, 96], strides = [1, 1]} : vector<8x128xf32> to vector<8x96xf32>
    %239 = vector.extract_strided_slice %237 {offsets = [0, 0], sizes = [8, 96], strides = [1, 1]} : vector<8x128xf32> to vector<8x96xf32>
    %240 = arith.addf %238, %239 : vector<8x96xf32>
    %241 = vector.extract_strided_slice %240 {offsets = [0, 0], sizes = [8, 32], strides = [1, 1]} : vector<8x96xf32> to vector<8x32xf32>
    %242 = arith.negf %241 : vector<8x32xf32>
    %243 = math.exp %242 : vector<8x32xf32>
    %cst_51 = arith.constant 1.000000e+00 : f32
    %244 = vector.broadcast %cst_51 : f32 to vector<8x32xf32>
    %245 = arith.addf %244, %243 : vector<8x32xf32>
    %246 = arith.divf %244, %245 : vector<8x32xf32>
    %247 = vector.extract_strided_slice %240 {offsets = [0, 32], sizes = [8, 32], strides = [1, 1]} : vector<8x96xf32> to vector<8x32xf32>
    %248 = arith.negf %247 : vector<8x32xf32>
    %249 = math.exp %248 : vector<8x32xf32>
    %cst_52 = arith.constant 1.000000e+00 : f32
    %250 = vector.broadcast %cst_52 : f32 to vector<8x32xf32>
    %251 = arith.addf %250, %249 : vector<8x32xf32>
    %252 = arith.divf %250, %251 : vector<8x32xf32>
    %253 = vector.extract_strided_slice %240 {offsets = [0, 64], sizes = [8, 32], strides = [1, 1]} : vector<8x96xf32> to vector<8x32xf32>
    %254 = vector.extract_strided_slice %237 {offsets = [0, 96], sizes = [8, 32], strides = [1, 1]} : vector<8x128xf32> to vector<8x32xf32>
    %255 = arith.addf %254, %6 : vector<8x32xf32>
    %256 = arith.mulf %246, %255 : vector<8x32xf32>
    %257 = arith.addf %253, %256 : vector<8x32xf32>
    %258 = math.tanh %257 : vector<8x32xf32>
    %cst_53 = arith.constant 1.000000e+00 : f32
    %259 = vector.broadcast %cst_53 : f32 to vector<8x32xf32>
    %260 = arith.subf %259, %252 : vector<8x32xf32>
    %261 = arith.mulf %260, %258 : vector<8x32xf32>
    %262 = arith.mulf %252, %236 : vector<8x32xf32>
    %263 = arith.addf %261, %262 : vector<8x32xf32>
    %c8_i32 = arith.constant 8 : i32
    %c0_54 = arith.constant 0 : index
    %c0_55 = arith.constant 0 : index
    %264 = vector.load %arg5[%c0_54, %c0_55] : memref<8x32xf32, #tpu.memory_space<vmem>>, vector<8x32xf32>
    tpu.vector_store %arg5[%c0_54, %c0_55], %263 {strides = array<i32>} : memref<8x32xf32, #tpu.memory_space<vmem>>, vector<8x32xf32>,
    return
  }
  func.func @transform_0(%arg0: i32, %arg1: i32) -> (i32, i32, i32) {
    %c0_i32 = arith.constant 0 : i32
    %c0_i32_0 = arith.constant 0 : i32
    return %arg1, %arg0, %c0_i32 : i32, i32, i32
  }
  func.func @transform_1(%arg0: i32, %arg1: i32) -> (i32, i32) {
    %c0_i32 = arith.constant 0 : i32
    %c0_i32_0 = arith.constant 0 : i32
    %c0_i32_1 = arith.constant 0 : i32
    return %c0_i32, %c0_i32_0 : i32, i32
  }
  func.func @transform_2(%arg0: i32, %arg1: i32) -> (i32, i32) {
    %c0_i32 = arith.constant 0 : i32
    %c0_i32_0 = arith.constant 0 : i32
    %c0_i32_1 = arith.constant 0 : i32
    return %c0_i32, %c0_i32_0 : i32, i32
  }
  func.func @transform_3(%arg0: i32, %arg1: i32) -> (i32, i32) {
    %c0_i32 = arith.constant 0 : i32
    %c0_i32_0 = arith.constant 0 : i32
    return %arg0, %c0_i32 : i32, i32
  }
}

</mosaic_0001>

<bundles_post_ra>
// kernel: tpu_custom_call.1
= control target key start
LH: loop header
LB: loop body
LE: loop exit
PB: predicated region body
PF: predicated region fallthrough
CT: control target
= control target key end

     0   :  { %8 = vsyncpa [#allocation3], 0  ;;  %s2031_s0 = inlined_call_operand.hbm [shape: f32[24,8,128], index: 0, kind: input, shape index: {}]   ;;  %s2032_s1 = inlined_call_operand.hbm [shape: f32[32,128], index: 1, kind: input, shape index: {}]   ;;  %s2033_s2 = inlined_call_operand.vmem [shape: f32[1,32], index: 2, kind: input, shape index: {}]   ;;  %s2034_s3 = inlined_call_operand.hbm [shape: f32[8,32], index: 3, kind: output, shape index: {}]  }
   0x1   :  { %10 = vsyncpa [#allocation3 + $0x1], 0 }
   0x2   :  { %11 = vsyncpa [#allocation6], 0 }
   0x3   :  { %12 = vsyncpa [#allocation4], 0  ;;  %s1715_s12 = smov 0   ;;  %s1717_s13 = smov 0  }
   0x4   :  { %s1719_s14 = smov 0   ;;  %s1721_s15 = smov 0  }
   0x5   :  { %s1723_s16 = smov 0   ;;  %s1725_s17 = smov 0  }
   0x6 LB: > { %s1193_s18 = sadd.s32 4294967295, %s1681_s17   ;;  %p52_p0 = scmp.ne.s32.totalorder %s1665_s13, %s1661_s12  ;;  %s1681_s17 = sphi %s1725_s17, %s18_s17   ;;  %s1677_s16 = sphi %s1723_s16, %s2052_s16   ;;  %s1673_s15 = sphi %s1721_s15, %s2051_s15   ;;  %s1669_s14 = sphi %s1719_s14, %s2050_s14   ;;  %s1665_s13 = sphi %s1717_s13, %s2049_s13   ;;  %s1661_s12 = sphi %s1715_s12, %s2048_s12  }
   0x7   : > { %p1747_p1 = scmp.eq.s32.totalorder %s1193_s18, 0  ;;  %p1194_p2 = scmp.ge.s32.totalorder %s1681_s17, 1 }
   0x8   : > { %p131_p3 = scmp.lt.s32.totalorder %s1681_s17, 4  ;;  %s1683_s22 = smov [#allocation5]  }
   0x9   : > { %s2039_s19 = scalar_select %p1747_p1, 1, 0 }
   0xa   : > { %p1755_p4 = por %p1747_p1, %p52_p0  ;;  %p1759_p5 = pnand %p1194_p2, %p131_p3 }
   0xb   : > { %s143_s23 = sshll.u32 %s1683_s22, 4  ;;  %s27_s25 = sadd.s32 1, %s1677_s16  ;;  %s144_s23 = int_to_ptr.vmem [resolvable:$true] %s143_s23 }
   0xc   : > { %s2040_s20 = scalar_select %p1755_p4, 1, 0 }
   0xd   : > { %s2041_s21 = scalar_select %p1759_p5, 1, 0 }
   0xe   : > { %p1419_p6 = pneg %p1759_p5  ;;  %s1539_s28 = scalar_lea.hbm %s2032_s1, 512 }
   0xf   : > { %p1540_p8 = scmp.ne.s32.totalorder %s2032_s1, %s1539_s28  ;;  %p1546_p12 = scmp.lt.u32.totalorder %s1539_s28, %s2032_s1 }
  0x10   : > { %p1767_p7 = pnand %p1419_p6, %p1747_p1 }
  0x12   : > { %p1541_p9 = pneg %p1767_p7 }
  0x14   : > { %p1542_p10 = pnand %p1541_p9, %p1540_p8 }
  0x16   : > { %p1543_p11 = pneg %p1542_p10 }
  0x18   : > { %p1548_p13 = pnand %p1546_p12, %p1543_p11 }
  0x1a   : > { %1551 = shalt.err (!%p1548_p13)
}
  0x1b   : > { %s1552_s6 = scalar_lea.vmem %s144_s23, 512  ;;  %p1560_p6 = scmp.lt.s32.totalorder %s144_s23, %s144_s23 }
  0x1c   : > { %p1553_p0 = scmp.ne.s32.totalorder %s144_s23, %s1552_s6  ;;  %p1561_p1 = scmp.lt.s32.totalorder %s1552_s6, %s1552_s6 }
  0x1e   : > { %p1555_p2 = pnand %p1553_p0, %p1541_p9  ;;  %p1562_p4 = por %p1561_p1, %p1560_p6 }
  0x20   : > { %p1556_p3 = pneg %p1555_p2 }
  0x22   : > { %p1563_p5 = pnand %p1562_p4, %p1556_p3 }
  0x24   : > { %1566 = shalt.err (!%p1563_p5)
}
  0x25   : > { %s1684_s7 = smov 128   ;;  %s1685_s8 = smov 8  }
  0x26   : > { %1422 = dma.hbm_to_vmem [thread:$0]  (!%p1767_p7), %s2032_s1, 512, %s144_s23, [#allocation6], %s1684_s7, %s1684_s7, %s1685_s8  }
  0x27   : > { %p28_p1 = scmp.ge.s32.totalorder %s27_s25, 3  ;;  %s39_s11 = sadd.s32 1, %s1669_s14 }
  0x28   : > { %p46_p4 = scmp.ne.s32.totalorder %s1669_s14, %s1665_s13  ;;  %p47_p5 = scmp.eq.s32.totalorder %s1681_s17, 0 }
  0x29   : > { %s2054_s25 = smov (%p28_p1, %s27_s25), 0  ;;  %p1428_p9 = scmp.lt.s32.totalorder %s1681_s17, 3 }
  0x2a   : > { %p48_p8 = por %p47_p5, %p46_p4  ;;  %s34_s12 = ssub.s32 %s1677_s16, %s2054_s25 }
  0x2b   : > { %s160_s22 = sand.u32 1, %s1669_s14   ;;  %p37_p10 = scmp.eq.s32.totalorder %s34_s12, 0 }
  0x2c   : > { %s1197_s24 = sshll.u32 %s160_s22, 6  ;;  %s1232_s26 = sshll.u32 %s1677_s16, 10 }
  0x2d   : > { %s1803_s27 = scalar_select %p37_p10, %s1669_s14, %s39_s11  }
  0x2e   : > { %s1808_s23 = scalar_lea.hbm %s2031_s0, %s1232_s26  ;;  %s164_s30 = scalar_lea.vmem [#allocation2], %s1197_s24 }
  0x2f   : > { %s172_s4 = sshll.u32 %s164_s30, 4  ;;  %p1810_p7 = pnand %p1428_p9, %p48_p8  ;;  %s1814_s4 = int_to_ptr.vmem [resolvable:$true] %s172_s4 }
  0x30   : > { %s1816_s6 = scalar_lea.sflag [#allocation3], %s160_s22  ;;  %s1567_s9 = scalar_lea.hbm %s1808_s23, 1024 }
  0x31   : > { %p1568_p11 = scmp.ne.s32.totalorder %s1808_s23, %s1567_s9  ;;  %p1569_p12 = pneg %p1810_p7 }
  0x32   : > { %s1572_s12 = scalar_lea.hbm %s2031_s0, 3072  ;;  %p1573_p2 = scmp.lt.u32.totalorder %s1808_s23, %s2031_s0 }
  0x33   : > { %p1570_p13 = pnand %p1569_p12, %p1568_p11  ;;  %p1574_p3 = scmp.lt.u32.totalorder %s1572_s12, %s1567_s9 }
  0x34   : > { %p1576_p1 = scmp.lt.u32.totalorder %s1567_s9, %s1808_s23 }
  0x35   : > { %p1571_p0 = pneg %p1570_p13  ;;  %p1575_p6 = por %p1574_p3, %p1573_p2 }
  0x37   : > { %p1577_p4 = por %p1576_p1, %p1575_p6 }
  0x39   : > { %p1578_p5 = pnand %p1577_p4, %p1571_p0 }
  0x3b   : > { %1581 = shalt.err (!%p1578_p5)
}
  0x3c   : > { %s1582_s22 = scalar_lea.vmem %s1814_s4, 1024  ;;  %s1686_s28 = smov [#allocation2]  }
  0x3d   : > { %p1583_p8 = scmp.ne.s32.totalorder %s1814_s4, %s1582_s22  ;;  %s1587_s29 = sshll.u32 %s1686_s28, 4  ;;  %s1588_s29 = int_to_ptr.vmem [resolvable:$false] %s1587_s29 }
  0x3e   : > { %s1589_s30 = scalar_lea.vmem %s1588_s29, 2048  ;;  %p1590_p11 = scmp.lt.s32.totalorder %s1814_s4, %s1588_s29 }
  0x3f   : > { %p1585_p9 = pnand %p1583_p8, %p1569_p12  ;;  %p1591_p13 = scmp.lt.s32.totalorder %s1589_s30, %s1582_s22 }
  0x41   : > { %p1586_p10 = pneg %p1585_p9  ;;  %p1592_p2 = por %p1591_p13, %p1590_p11 }
  0x43   : > { %p1593_p3 = pnand %p1592_p2, %p1586_p10 }
  0x45   : > { %1596 = shalt.err (!%p1593_p3)
}
  0x46   : > { %1426 = dma.hbm_to_vmem [thread:$0]  (!%p1810_p7), %s1808_s23, 1024, %s1814_s4, %s1816_s6, %s1684_s7, %s1684_s7, %s1685_s8  }
  0x47   : > { %p2044_p12 = scmp.ne.s32.totalorder %s2041_s21, 0 }
  0x48   : > { %s186_s9 = sand.u32 (!%p2044_p12), 1, %s1665_s13   ;;  %p2045_p0 = scmp.ne.s32.totalorder (!%p2044_p12), %s2040_s20, 0 }
  0x49   : > { %184 = sbr.rel (%p2044_p12) target bundleno = 5784 (0x1698), region = 32  ;;  %s1201_s10 = sshll.u32 (!%p2044_p12), %s186_s9, 6 }
  0x4a   : > { %s187_s11 = scalar_lea.sflag (!%p2044_p12), [#allocation3], %s186_s9  ;;  %s1850_s12 = scalar_lea.vmem (!%p2044_p12), [#allocation2], %s1201_s10 }
  0x50   : > { %1648 = dma.done.wait (%p2045_p0), %s187_s11, 1024  }
  0x51   : > { %1650 = vsyncadd (%p2045_p0), %s187_s11, 4294966272  ;;  %p2046_p6 = scmp.ne.s32.totalorder %s2039_s19, 0 }
  0x53   : > { %1652 = dma.done.wait (%p2046_p6), [#allocation6], 512  }
  0x54   : > { %1654 = vsyncadd (%p2046_p6), [#allocation6], 4294966784  ;;  %p1203_p7 = scmp.ne.s32.totalorder %s1673_s15, 0 }
  0x55   : > { %vm217_vm0 = vcmask (!%p1203_p7), 261120   ;;  %v1687_v0 = vmov (!%p1203_p7), 0.0  }
  0x56   : > { %216 = sbr.rel (%p1203_p7) target bundleno = 93 (0x5d), region = 44  ;;  %218 = vst.msk [vmem:[#allocation7] sm:$0xff] (!%p1203_p7), %vm217_vm0, %v1687_v0 }
  0x5d PF: > { %v230_v1 = vld [vmem:[%s1850_s12] sm:$0xff]  ;;  %v220_v3 = vld [vmem:[#allocation5 + $0x8] sm:$0xff]  ;;  %s1688_s21 = smov 32   ;;  %v1689_v4 = vmov 0.0|0.0   ;;  %v221_v6 = vld [vmem:[#allocation5 + $0x10] sm:$0xff]  ;;  %vm1690_vm1 = vmmov 0  }
  0x5e   : > { %v219_v2 = vld [vmem:[#allocation5] sm:$0xff]  ;;  %232 = vrot.lane.b32.xlu0 %v230_v1, %s1688_s21  ;;  %1361 = vmatprep.subr.bf16.mxu0 %v1689_v4  ;;  %v222_v7 = vld [vmem:[#allocation5 + $0x18] sm:$0xff]  ;;  %v1691_v8 = vmov 0.0   ;;  %s1692_s20 = smov 96   ;;  %vm236_vm2 = vcmask 261120   ;;  %s1693_s7 = smov 64  }
  0x5f   : > { %v1864_v5 = vpack.c.bf16 %v220_v3, %v219_v2  ;;  %1281 = vmatprep.mubr.msk.f32.mxu0 %vm1690_vm1, %v1691_v8  ;;  %v1204_v9 = vld [vmem:[%s2033_s2] ss:$0 sm:$0xff]  ;;  %1367 = vmatprep.subr.bf16.mxu1 %v1689_v4  ;;  %v1873_v10 = vpack.c.bf16 %v222_v7, %v221_v6  ;;  %v1207_v28 = vld [vmem:[%s1850_s12 + $0x8] sm:$0xff]  ;;  %v1210_v48 = vld [vmem:[%s1850_s12 + $0x10] sm:$0xff]  ;;  %s1694_s8 = smov [#allocation7]   ;;  %p1986_p1 = scmp.eq.s32.totalorder %s1193_s18, 2 }
  0x60   : > { %1292 = vmatprep.mubr.msk.f32.mxu1 %vm1690_vm1, %v1691_v8  ;;  %v229_v11 = vld [vmem:[#allocation7] sm:$0xff]  ;;  %s1120_s23 = sshll.u32 %s1694_s8, 4  ;;  %s1121_s23 = int_to_ptr.vmem [resolvable:$true] %s1120_s23 }
  0x61   : > { %1363 = vmatpush3.bf16.msra.mxu0 %v1864_v5  ;;  %1369 = vmatpush3.bf16.msra.mxu1 %v1864_v5  ;;  %s1597_s5 = scalar_lea.vmem %s1121_s23, 128  ;;  %p1604_p9 = scmp.lt.s32.totalorder %s1121_s23, %s1121_s23 }
  0x62   : > { %1364 = vmatprep.subr.bf16.mxu0 %v1689_v4  ;;  %1370 = vmatprep.subr.bf16.mxu1 %v1689_v4  ;;  %p1598_p4 = scmp.ne.s32.totalorder %s1121_s23, %s1597_s5  ;;  %p1605_p10 = scmp.lt.s32.totalorder %s1597_s5, %s1597_s5 }
  0x63   : > { %317 = vrot.lane.b32.xlu0 %v1204_v9, %s1692_s20  ;;  %v1213_v9 = vld [vmem:[%s1850_s12 + $0x18] sm:$0xff] }
  0x64   : > { %p1599_p5 = pnand %p1598_p4, %p1986_p1  ;;  %p1606_p11 = por %p1605_p10, %p1604_p9 }
  0x65   : > { %1366 = vmatpush3.bf16.msra.mxu0 %v1873_v10  ;;  %1372 = vmatpush3.bf16.msra.mxu1 %v1873_v10 }
  0x66   : > { %1373 = vmatprep.subr.bf16.mxu0 %v1689_v4  ;;  %1379 = vmatprep.subr.bf16.mxu1 %v1689_v4  ;;  %p1600_p8 = pneg %p1599_p5 }
  0x68   : > { %p1607_p13 = pnand %p1606_p11, %p1600_p8 }
  0xd0   : > { %v233_v12 = vpop.permute.xlu0 %232 }
  0xd1   : > { %v235_v13 = vmul.f32 %v233_v12, %v229_v11 }
  0xd3   : > { %1282 = vmatmul.mubr.msk.f32.vlgmr.msra.gmra.mrb[0].mxu0 %vm236_vm2, %v235_v13 }
  0xd4   : > { %1375 = vmatpush3.bf16.msra.mxu0 %v1864_v5  ;;  %1303 = vmatprep.mubr.msk.f32.mxu0 %vm1690_vm1, %v1691_v8 }
  0xd5   : > { %1376 = vmatprep.subr.bf16.mxu0 %v1689_v4  ;;  %v1892_v14 = vpop.permute.xlu0 %317 }
  0xd8   : > { %1378 = vmatpush3.bf16.msra.mxu0 %v1873_v10 }
  0xd9   : > { %1385 = vmatprep.subr.bf16.mxu0 %v1689_v4 }
 0x1a6   : > { %v306_v15 = vpop.f32.mrb[0].mxu0 }
 0x1a7   : > { %v1283_v16 = vpop.f32.mrb[1].mxu0  ;;  %v320_v17 = vadd.f32 %v1892_v14, %v306_v15  ;;  %v310_v18 = vadd.f32 %v306_v15, %v230_v1 }
 0x1a9   : > { %322 = vrot.lane.b32.xlu1 %v320_v17, %s1688_s21  ;;  %v1206_v19 = vmul.f32 -1.442695, %v310_v18 }
 0x1ab   : > { %1491 = vpow2.f32 %v1206_v19 }
 0x1b5   : > { %v1492_v20 = vpop.eup %1491 }
 0x1b6   : > { %v314_v21 = vadd.f32 1.0, %v1492_v20 }
 0x1b8   : > { %1493 = vrcp.f32 %v314_v21 }
 0x1c2   : > { %v1494_v22 = vpop.eup %1493 }
 0x1c3   : > { %v332_v30 = vsub.f32 1.0, %v1494_v22 }
 0x21b   : > { %v323_v23 = vpop.permute.xlu1 %322 }
 0x21c   : > { %v325_v24 = vmul.f32 %v1494_v22, %v323_v23 }
 0x21e   : > { %327 = vrot.lane.b32.xlu1 %v325_v24, %s1693_s7 }
 0x222   : > { %338 = vrot.lane.b32.xlu1 %v235_v13, %s1688_s21 }
 0x290   : > { %v328_v25 = vpop.permute.xlu1 %327 }
 0x291   : > { %v330_v26 = vadd.f32 %v328_v25, %v310_v18 }
 0x293   : > { %1495 = vtanh.f32 %v330_v26 }
 0x294   : > { %v339_v29 = vpop.permute.xlu1 %338 }
 0x295   : > { %v341_v32 = vmul.f32 %v1494_v22, %v339_v29 }
 0x29d   : > { %v1496_v27 = vpop.eup %1495 }
 0x29e   : > { %334 = vrot.lane.b32.xlu0 %v1496_v27, %s1692_s20 }
 0x2a2   : > { %346 = vrot.lane.b32.xlu0 %v1207_v28, %s1693_s7 }
 0x310   : > { %v335_v31 = vpop.permute.xlu0 %334 }
 0x311   : > { %v337_v33 = vmul.f32 %v335_v31, %v332_v30 }
 0x313   : > { %v342_v34 = vadd.f32 %v341_v32, %v337_v33  ;;  %v1216_v33 = vld [vmem:[%s1850_s12 + $0x20] sm:$0xff] }
 0x314   : > { %v347_v35 = vpop.permute.xlu0 %346 }
 0x315   : > { %v349_v36 = vmul.f32 %v347_v35, %v342_v34 }
 0x317   : > { %351 = vrot.lane.b32.xlu1 %v349_v36, %s1692_s20 }
 0x389   : > { %v352_v37 = vpop.permute.xlu1 %351 }
 0x38a   : > { %1293 = vmatmul.mubr.msk.f32.vlgmr.msra.gmra.mrb[0].mxu1 %vm236_vm2, %v352_v37 }
 0x38b   : > { %1381 = vmatpush3.bf16.msra.mxu1 %v1864_v5  ;;  %1314 = vmatprep.mubr.msk.f32.mxu1 %vm1690_vm1, %v1691_v8 }
 0x38c   : > { %1382 = vmatprep.subr.bf16.mxu1 %v1689_v4 }
 0x38f   : > { %1384 = vmatpush3.bf16.msra.mxu1 %v1873_v10 }
 0x390   : > { %1391 = vmatprep.subr.bf16.mxu1 %v1689_v4 }
 0x45d   : > { %v421_v38 = vpop.f32.mrb[0].mxu1 }
 0x45e   : > { %v432_v39 = vadd.f32 %v421_v38, %v1892_v14  ;;  %v1294_v40 = vpop.f32.mrb[1].mxu1  ;;  %v425_v41 = vadd.f32 %v1207_v28, %v421_v38 }
 0x460   : > { %434 = vrot.lane.b32.xlu0 %v432_v39, %s1688_s21  ;;  %v1209_v42 = vmul.f32 -1.442695, %v425_v41 }
 0x462   : > { %1497 = vpow2.f32 %v1209_v42 }
 0x46c   : > { %v1498_v43 = vpop.eup %1497 }
 0x46d   : > { %v429_v44 = vadd.f32 1.0, %v1498_v43 }
 0x46f   : > { %1499 = vrcp.f32 %v429_v44 }
 0x479   : > { %v1500_v45 = vpop.eup %1499 }
 0x47a   : > { %v444_v52 = vsub.f32 1.0, %v1500_v45  ;;  %v450_v55 = vmul.f32 %v1500_v45, %v349_v36 }
 0x4d2   : > { %v435_v46 = vpop.permute.xlu0 %434 }
 0x4d3   : > { %v437_v47 = vmul.f32 %v1500_v45, %v435_v46 }
 0x4d5   : > { %439 = vrot.lane.b32.xlu1 %v437_v47, %s1693_s7 }
 0x4d9   : > { %455 = vrot.lane.b32.xlu1 %v1210_v48, %s1693_s7 }
 0x547   : > { %v440_v49 = vpop.permute.xlu1 %439 }
 0x548   : > { %v442_v50 = vadd.f32 %v440_v49, %v425_v41 }
 0x54a   : > { %1501 = vtanh.f32 %v442_v50 }
 0x54b   : > { %v456_v56 = vpop.permute.xlu1 %455 }
 0x554   : > { %v1502_v51 = vpop.eup %1501 }
 0x555   : > { %446 = vrot.lane.b32.xlu0 %v1502_v51, %s1692_s20 }
 0x5c7   : > { %v447_v53 = vpop.permute.xlu0 %446 }
 0x5c8   : > { %v449_v54 = vmul.f32 %v447_v53, %v444_v52 }
 0x5ca   : > { %v451_v57 = vadd.f32 %v450_v55, %v449_v54  ;;  %v1219_v55 = vld [vmem:[%s1850_s12 + $0x28] sm:$0xff] }
 0x5cc   : > { %v458_v58 = vmul.f32 %v456_v56, %v451_v57 }
 0x5ce   : > { %460 = vrot.lane.b32.xlu0 %v458_v58, %s1692_s20 }
 0x640   : > { %v461_v59 = vpop.permute.xlu0 %460 }
 0x641   : > { %1304 = vmatmul.mubr.msk.f32.vlgmr.msra.gmra.mrb[2].mxu0 %vm236_vm2, %v461_v59 }
 0x642   : > { %1387 = vmatpush3.bf16.msra.mxu0 %v1864_v5  ;;  %1325 = vmatprep.mubr.msk.f32.mxu0 %vm1690_vm1, %v1691_v8 }
 0x643   : > { %1388 = vmatprep.subr.bf16.mxu0 %v1689_v4 }
 0x646   : > { %1390 = vmatpush3.bf16.msra.mxu0 %v1873_v10 }
 0x647   : > { %1397 = vmatprep.subr.bf16.mxu0 %v1689_v4 }
 0x714   : > { %v530_v60 = vpop.f32.mrb[2].mxu0 }
 0x715   : > { %v541_v61 = vadd.f32 %v530_v60, %v1892_v14  ;;  %v1305_v62 = vpop.f32.mrb[3].mxu0  ;;  %v534_v63 = vadd.f32 %v1210_v48, %v530_v60 }
 0x717   : > { %543 = vrot.lane.b32.xlu1 %v541_v61, %s1688_s21  ;;  %v1212_v0 = vmul.f32 -1.442695, %v534_v63 }
 0x719   : > { %1503 = vpow2.f32 %v1212_v0 }
 0x723   : > { %v1504_v1 = vpop.eup %1503 }
 0x724   : > { %v538_v2 = vadd.f32 1.0, %v1504_v1 }
 0x726   : > { %1505 = vrcp.f32 %v538_v2 }
 0x730   : > { %v1506_v3 = vpop.eup %1505 }
 0x731   : > { %v553_v15 = vsub.f32 1.0, %v1506_v3  ;;  %v559_v18 = vmul.f32 %v1506_v3, %v458_v58 }
 0x789   : > { %v544_v6 = vpop.permute.xlu1 %543 }
 0x78a   : > { %v546_v7 = vmul.f32 %v1506_v3, %v544_v6 }
 0x78c   : > { %548 = vrot.lane.b32.xlu0 %v546_v7, %s1693_s7 }
 0x790   : > { %564 = vrot.lane.b32.xlu0 %v1213_v9, %s1693_s7 }
 0x7fe   : > { %v549_v11 = vpop.permute.xlu0 %548 }
 0x7ff   : > { %v551_v12 = vadd.f32 %v549_v11, %v534_v63 }
 0x801   : > { %1507 = vtanh.f32 %v551_v12 }
 0x802   : > { %v565_v19 = vpop.permute.xlu0 %564 }
 0x80b   : > { %v1508_v13 = vpop.eup %1507 }
 0x80c   : > { %555 = vrot.lane.b32.xlu1 %v1508_v13, %s1692_s20 }
 0x87e   : > { %v556_v16 = vpop.permute.xlu1 %555 }
 0x87f   : > { %v558_v17 = vmul.f32 %v556_v16, %v553_v15 }
 0x881   : > { %v560_v20 = vadd.f32 %v559_v18, %v558_v17 }
 0x883   : > { %v567_v21 = vmul.f32 %v565_v19, %v560_v20 }
 0x885   : > { %569 = vrot.lane.b32.xlu1 %v567_v21, %s1692_s20 }
 0x8f7   : > { %v570_v22 = vpop.permute.xlu1 %569 }
 0x8f8   : > { %1315 = vmatmul.mubr.msk.f32.vlgmr.msra.gmra.mrb[2].mxu1 %vm236_vm2, %v570_v22 }
 0x8f9   : > { %1393 = vmatpush3.bf16.msra.mxu1 %v1864_v5  ;;  %1336 = vmatprep.mubr.msk.f32.mxu1 %vm1690_vm1, %v1691_v8 }
 0x8fa   : > { %1394 = vmatprep.subr.bf16.mxu1 %v1689_v4 }
 0x8fd   : > { %1396 = vmatpush3.bf16.msra.mxu1 %v1873_v10 }
 0x8fe   : > { %1403 = vmatprep.subr.bf16.mxu1 %v1689_v4 }
 0x9cb   : > { %v639_v23 = vpop.f32.mrb[2].mxu1 }
 0x9cc   : > { %v650_v24 = vadd.f32 %v639_v23, %v1892_v14  ;;  %v1316_v25 = vpop.f32.mrb[3].mxu1  ;;  %v643_v26 = vadd.f32 %v1213_v9, %v639_v23 }
 0x9ce   : > { %652 = vrot.lane.b32.xlu0 %v650_v24, %s1688_s21  ;;  %v1215_v27 = vmul.f32 -1.442695, %v643_v26 }
 0x9d0   : > { %1509 = vpow2.f32 %v1215_v27 }
 0x9da   : > { %v1510_v28 = vpop.eup %1509 }
 0x9db   : > { %v647_v29 = vadd.f32 1.0, %v1510_v28 }
 0x9dd   : > { %1511 = vrcp.f32 %v647_v29 }
 0x9e7   : > { %v1512_v30 = vpop.eup %1511 }
 0x9e8   : > { %v662_v37 = vsub.f32 1.0, %v1512_v30  ;;  %v668_v40 = vmul.f32 %v1512_v30, %v567_v21 }
 0xa40   : > { %v653_v31 = vpop.permute.xlu0 %652 }
 0xa41   : > { %v655_v32 = vmul.f32 %v1512_v30, %v653_v31 }
 0xa43   : > { %657 = vrot.lane.b32.xlu1 %v655_v32, %s1693_s7 }
 0xa47   : > { %673 = vrot.lane.b32.xlu1 %v1216_v33, %s1693_s7 }
 0xab5   : > { %v658_v34 = vpop.permute.xlu1 %657 }
 0xab6   : > { %v660_v35 = vadd.f32 %v658_v34, %v643_v26 }
 0xab8   : > { %1513 = vtanh.f32 %v660_v35 }
 0xab9   : > { %v674_v41 = vpop.permute.xlu1 %673 }
 0xac2   : > { %v1514_v36 = vpop.eup %1513 }
 0xac3   : > { %664 = vrot.lane.b32.xlu0 %v1514_v36, %s1692_s20  ;;  %v1225_v36 = vld [vmem:[%s1850_s12 + $0x38] sm:$0xff] }
 0xb35   : > { %v665_v38 = vpop.permute.xlu0 %664 }
 0xb36   : > { %v667_v39 = vmul.f32 %v665_v38, %v662_v37 }
 0xb38   : > { %v669_v42 = vadd.f32 %v668_v40, %v667_v39 }
 0xb3a   : > { %v676_v43 = vmul.f32 %v674_v41, %v669_v42 }
 0xb3c   : > { %678 = vrot.lane.b32.xlu0 %v676_v43, %s1692_s20 }
 0xbae   : > { %v679_v44 = vpop.permute.xlu0 %678 }
 0xbaf   : > { %1326 = vmatmul.mubr.msk.f32.vlgmr.msra.gmra.mrb[4].mxu0 %vm236_vm2, %v679_v44 }
 0xbb0   : > { %1399 = vmatpush3.bf16.msra.mxu0 %v1864_v5  ;;  %1347 = vmatprep.mubr.msk.f32.mxu0 %vm1690_vm1, %v1691_v8 }
 0xbb1   : > { %1400 = vmatprep.subr.bf16.mxu0 %v1689_v4 }
 0xbb4   : > { %1402 = vmatpush3.bf16.msra.mxu0 %v1873_v10 }
 0xc82   : > { %v748_v45 = vpop.f32.mrb[4].mxu0 }
 0xc83   : > { %v759_v46 = vadd.f32 %v748_v45, %v1892_v14  ;;  %v1327_v47 = vpop.f32.mrb[5].mxu0  ;;  %v752_v48 = vadd.f32 %v1216_v33, %v748_v45 }
 0xc85   : > { %761 = vrot.lane.b32.xlu1 %v759_v46, %s1688_s21  ;;  %v1218_v49 = vmul.f32 -1.442695, %v752_v48 }
 0xc87   : > { %1515 = vpow2.f32 %v1218_v49 }
 0xc91   : > { %v1516_v50 = vpop.eup %1515 }
 0xc92   : > { %v756_v51 = vadd.f32 1.0, %v1516_v50 }
 0xc94   : > { %1517 = vrcp.f32 %v756_v51 }
 0xc9e   : > { %v1518_v52 = vpop.eup %1517 }
 0xc9f   : > { %v771_v59 = vsub.f32 1.0, %v1518_v52  ;;  %v777_v62 = vmul.f32 %v1518_v52, %v676_v43 }
 0xcf7   : > { %v762_v53 = vpop.permute.xlu1 %761 }
 0xcf8   : > { %v764_v54 = vmul.f32 %v1518_v52, %v762_v53 }
 0xcfa   : > { %766 = vrot.lane.b32.xlu0 %v764_v54, %s1693_s7 }
 0xcfe   : > { %782 = vrot.lane.b32.xlu0 %v1219_v55, %s1693_s7 }
 0xd6c   : > { %v767_v56 = vpop.permute.xlu0 %766 }
 0xd6d   : > { %v769_v57 = vadd.f32 %v767_v56, %v752_v48 }
 0xd6f   : > { %1519 = vtanh.f32 %v769_v57 }
 0xd70   : > { %v783_v63 = vpop.permute.xlu0 %782 }
 0xd79   : > { %v1520_v58 = vpop.eup %1519 }
 0xd7a   : > { %773 = vrot.lane.b32.xlu1 %v1520_v58, %s1692_s20 }
 0xdec   : > { %v774_v60 = vpop.permute.xlu1 %773 }
 0xded   : > { %v776_v61 = vmul.f32 %v774_v60, %v771_v59 }
 0xdef   : > { %v778_v0 = vadd.f32 %v777_v62, %v776_v61 }
 0xdf1   : > { %v785_v1 = vmul.f32 %v783_v63, %v778_v0 }
 0xdf3   : > { %787 = vrot.lane.b32.xlu1 %v785_v1, %s1692_s20 }
 0xe65   : > { %v788_v2 = vpop.permute.xlu1 %787 }
 0xe66   : > { %1337 = vmatmul.mubr.msk.f32.vlgmr.msra.gmra.mrb[4].mxu1 %vm236_vm2, %v788_v2 }
 0xe67   : > { %1405 = vmatpush3.bf16.msra.mxu1 %v1864_v5  ;;  %1358 = vmatprep.mubr.msk.f32.mxu1 %vm1690_vm1, %v1691_v8 }
 0xe68   : > { %1406 = vmatprep.subr.bf16.mxu1 %v1689_v4  ;;  %v1222_v4 = vld [vmem:[%s1850_s12 + $0x30] sm:$0xff] }
 0xe6b   : > { %1408 = vmatpush3.bf16.msra.mxu1 %v1873_v10 }
 0xf39   : > { %v857_v3 = vpop.f32.mrb[4].mxu1 }
 0xf3a   : > { %v868_v6 = vadd.f32 %v857_v3, %v1892_v14  ;;  %v1338_v7 = vpop.f32.mrb[5].mxu1  ;;  %v861_v9 = vadd.f32 %v1219_v55, %v857_v3 }
 0xf3c   : > { %870 = vrot.lane.b32.xlu0 %v868_v6, %s1688_s21  ;;  %v1221_v11 = vmul.f32 -1.442695, %v861_v9 }
 0xf3e   : > { %1521 = vpow2.f32 %v1221_v11 }
 0xf48   : > { %v1522_v12 = vpop.eup %1521 }
 0xf49   : > { %v865_v13 = vadd.f32 1.0, %v1522_v12 }
 0xf4b   : > { %1523 = vrcp.f32 %v865_v13 }
 0xf55   : > { %v1524_v5 = vpop.eup %1523 }
 0xf56   : > { %v880_v18 = vsub.f32 1.0, %v1524_v5  ;;  %v886_v21 = vmul.f32 %v1524_v5, %v785_v1 }
 0xfae   : > { %v871_v15 = vpop.permute.xlu0 %870 }
 0xfaf   : > { %v873_v8 = vmul.f32 %v1524_v5, %v871_v15 }
 0xfb1   : > { %875 = vrot.lane.b32.xlu1 %v873_v8, %s1693_s7 }
 0xfb5   : > { %891 = vrot.lane.b32.xlu1 %v1222_v4, %s1693_s7 }
0x1023   : > { %v876_v10 = vpop.permute.xlu1 %875 }
0x1024   : > { %v878_v16 = vadd.f32 %v876_v10, %v861_v9 }
0x1026   : > { %1525 = vtanh.f32 %v878_v16 }
0x1027   : > { %v892_v22 = vpop.permute.xlu1 %891 }
0x1030   : > { %v1526_v17 = vpop.eup %1525 }
0x1031   : > { %882 = vrot.lane.b32.xlu0 %v1526_v17, %s1692_s20 }
0x10a3   : > { %v883_v19 = vpop.permute.xlu0 %882 }
0x10a4   : > { %v885_v20 = vmul.f32 %v883_v19, %v880_v18 }
0x10a6   : > { %v887_v23 = vadd.f32 %v886_v21, %v885_v20 }
0x10a8   : > { %v894_v24 = vmul.f32 %v892_v22, %v887_v23 }
0x10aa   : > { %896 = vrot.lane.b32.xlu0 %v894_v24, %s1692_s20 }
0x111c   : > { %v897_v25 = vpop.permute.xlu0 %896 }
0x111d   : > { %1348 = vmatmul.mubr.msk.f32.vlgmr.msra.gmra.mrb[6].mxu0 %vm236_vm2, %v897_v25 }
0x11f0   : > { %v966_v26 = vpop.f32.mrb[6].mxu0 }
0x11f1   : > { %v977_v27 = vadd.f32 %v966_v26, %v1892_v14  ;;  %v1349_v28 = vpop.f32.mrb[7].mxu0  ;;  %v970_v29 = vadd.f32 %v1222_v4, %v966_v26 }
0x11f3   : > { %979 = vrot.lane.b32.xlu1 %v977_v27, %s1688_s21  ;;  %v1224_v30 = vmul.f32 -1.442695, %v970_v29 }
0x11f5   : > { %1527 = vpow2.f32 %v1224_v30 }
0x11ff   : > { %v1528_v31 = vpop.eup %1527 }
0x1200   : > { %v974_v32 = vadd.f32 1.0, %v1528_v31 }
0x1202   : > { %1529 = vrcp.f32 %v974_v32 }
0x120c   : > { %v1530_v33 = vpop.eup %1529 }
0x120d   : > { %v989_v40 = vsub.f32 1.0, %v1530_v33  ;;  %v995_v43 = vmul.f32 %v1530_v33, %v894_v24 }
0x1265   : > { %v980_v34 = vpop.permute.xlu1 %979 }
0x1266   : > { %v982_v35 = vmul.f32 %v1530_v33, %v980_v34 }
0x1268   : > { %984 = vrot.lane.b32.xlu0 %v982_v35, %s1693_s7 }
0x126c   : > { %1000 = vrot.lane.b32.xlu0 %v1225_v36, %s1693_s7 }
0x12da   : > { %v985_v37 = vpop.permute.xlu0 %984 }
0x12db   : > { %v987_v38 = vadd.f32 %v985_v37, %v970_v29 }
0x12dd   : > { %1531 = vtanh.f32 %v987_v38 }
0x12de   : > { %v1001_v44 = vpop.permute.xlu0 %1000 }
0x12e7   : > { %v1532_v39 = vpop.eup %1531 }
0x12e8   : > { %991 = vrot.lane.b32.xlu1 %v1532_v39, %s1692_s20 }
0x135a   : > { %v992_v41 = vpop.permute.xlu1 %991 }
0x135b   : > { %v994_v42 = vmul.f32 %v992_v41, %v989_v40 }
0x135d   : > { %v996_v45 = vadd.f32 %v995_v43, %v994_v42 }
0x135f   : > { %v1003_v46 = vmul.f32 %v1001_v44, %v996_v45 }
0x1361   : > { %1005 = vrot.lane.b32.xlu1 %v1003_v46, %s1692_s20 }
0x13d3   : > { %v1006_v47 = vpop.permute.xlu1 %1005 }
0x13d4   : > { %1359 = vmatmul.mubr.msk.f32.vlgmr.msra.gmra.mrb[6].mxu1 %vm236_vm2, %v1006_v47 }
0x14a7   : > { %v1075_v48 = vpop.f32.mrb[6].mxu1 }
0x14a8   : > { %v1086_v49 = vadd.f32 %v1075_v48, %v1892_v14  ;;  %v1360_v50 = vpop.f32.mrb[7].mxu1  ;;  %v1079_v51 = vadd.f32 %v1225_v36, %v1075_v48 }
0x14aa   : > { %1088 = vrot.lane.b32.xlu0 %v1086_v49, %s1688_s21  ;;  %v1227_v52 = vmul.f32 -1.442695, %v1079_v51 }
0x14ac   : > { %1533 = vpow2.f32 %v1227_v52 }
0x14b6   : > { %v1534_v53 = vpop.eup %1533 }
0x14b7   : > { %v1083_v54 = vadd.f32 1.0, %v1534_v53 }
0x14b9   : > { %1535 = vrcp.f32 %v1083_v54 }
0x14c3   : > { %v1536_v55 = vpop.eup %1535 }
0x14c4   : > { %v1098_v14 = vsub.f32 1.0, %v1536_v55  ;;  %v1104_v62 = vmul.f32 %v1536_v55, %v1003_v46 }
0x151c   : > { %v1089_v56 = vpop.permute.xlu0 %1088 }
0x151d   : > { %v1091_v57 = vmul.f32 %v1536_v55, %v1089_v56 }
0x151f   : > { %1093 = vrot.lane.b32.xlu1 %v1091_v57, %s1693_s7 }
0x1591   : > { %v1094_v58 = vpop.permute.xlu1 %1093 }
0x1592   : > { %v1096_v59 = vadd.f32 %v1094_v58, %v1079_v51 }
0x1594   : > { %1537 = vtanh.f32 %v1096_v59 }
0x159e   : > { %v1538_v60 = vpop.eup %1537 }
0x159f   : > { %1100 = vrot.lane.b32.xlu0 %v1538_v60, %s1692_s20 }
0x1611   : > { %v1101_v61 = vpop.permute.xlu0 %1100 }
0x1612   : > { %v1103_v63 = vmul.f32 %v1101_v61, %v1098_v14 }
0x1614   : > { %v1105_v0 = vadd.f32 %v1104_v62, %v1103_v63 }
0x1616   : > { %1107 = vrot.lane.b32.xlu1 %v1105_v0, %s1692_s20 }
0x1688   : > { %v1108_v1 = vpop.permute.xlu1 %1107 }
0x1689   : > { %1110 = vst.msk [vmem:[#allocation7] sm:$0xff] %vm236_vm2, %v1108_v1 }
0x168a   : > { %1610 = shalt.err (!%p1607_p13)
}
0x168b   : > { %s1611_s24 = scalar_lea.hbm %s2034_s3, 128 }
0x168c   : > { %p1612_p2 = scmp.ne.s32.totalorder %s2034_s3, %s1611_s24  ;;  %p1617_p0 = scmp.lt.u32.totalorder %s1611_s24, %s2034_s3 }
0x168e   : > { %p1613_p3 = pnand %p1612_p2, %p1986_p1 }
0x1690   : > { %p1614_p12 = pneg %p1613_p3 }
0x1692   : > { %p1619_p6 = pnand %p1617_p0, %p1614_p12 }
0x1694   : > { %1622 = shalt.err (!%p1619_p6)
}
0x1695   : > { %1416 = dma.vmem_to_hbm [thread:$0]  (%p1986_p1), %s1121_s23, 128, %s2034_s3, [#allocation4]  }
0x1696   : > { %1656 = dma.done.wait (%p1986_p1), [#allocation4], 128  }
0x1697   : > { %1658 = vsyncadd (%p1986_p1), [#allocation4], 4294967168 }
0x1698 PF: > { %s18_s17 = sadd.s32 1, %s1681_s17   ;;  %s2048_s12 = smov %s1665_s13 }
0x1699   : > { %p15_p7 = scmp.ge.s32.totalorder %s18_s17, 5   ;;  %s2049_s13 = smov %s1669_s14 }
0x169a   : > { %s2050_s14 = smov %s1803_s27  ;;  %s2051_s15 = smov %s1677_s16 }
0x169b   : > { %s2052_s16 = smov %s2054_s25  ;;  %17 = sbr.rel (!%p15_p7) target bundleno = 6 (0x6), region = 85 }
0x16a2   :  { %1133 = vsyncpa [#allocation3], 1 }
0x16a3   :  { %1135 = vsyncpa [#allocation3 + $0x1], 1 }
0x16a4   :  { %1136 = vsyncpa [#allocation6], 1 }
0x16a5   :  { %1137 = vsyncpa [#allocation4], 1 }
0x16a6   :  { %1139 = vsyncpa [#allocation4 + $0x1], 1 }

</bundles_post_ra>
